<compile_context>
chip_gen: v7x
topology: tpu7x:2x2x1
jax: 0.10.0
libtpu: 0.0.40
codegen_flags: <defaults>
</compile_context>

<pallas_src>
import jax
import jax.numpy as jnp
from jax.experimental import pallas as pl
from jax.experimental.pallas import tpu as pltpu


D_MODEL = 128
D_COORD = 2
D_STATE = 2
D_TGT = 4

_SQRT_HALF = 0.7071067811865476  # 1/sqrt(2)

MAX_TILE = 4096          # rows per grid step (multiple of 512; ~6-8 MiB live f32 activations)
SPLIT_ROWS = 512         # above this, force >= 2 grid steps so both v7x TCs get work
VMEM_LIMIT = 32 * 1024 * 1024   # keep 32 MiB: safe on v7x (64 MiB/TC) and explicit on v5e


def _k2_linear(x, w_ref, b_ref):
    # (rows, 2) @ (2, out) as a VPU outer product — a K=2 matmul would waste an MXU push.
    w = w_ref[...]
    return x[:, 0:1] * w[0:1, :] + x[:, 1:2] * w[1:2, :] + b_ref[...]


def _geom_bias_kernel(length_ref, coords_ref, gw1, gb1, gw2, gb2, w_gf, b_f1, out_ref):
    """Runs once (grid=(1,)): whole geom branch folded into a single (1,128) bias row."""
    nc = coords_ref.shape[0]
    h = jnp.maximum(_k2_linear(coords_ref[...], gw1, gb1), 0.0)                      # (Nc, 64)
    h = jnp.maximum(
        jnp.dot(h, gw2[...], preferred_element_type=jnp.float32) + gb2[...], 0.0)    # (Nc, 128)

    length = jnp.minimum(length_ref[0], nc)                 # clamp: torch slice clamps too
    inv_len = 1.0 / jnp.maximum(length, 1).astype(jnp.float32)   # guard length==0 (no NaN)
    col = jax.lax.broadcasted_iota(jnp.int32, (1, nc), 1)
    mask = (col < length).astype(jnp.float32)                                        # (1, Nc)
    # Masked mean as a mask-row matmul on the MXU (no sublane/XLU reduce).
    mean_h = jnp.dot(mask, h, preferred_element_type=jnp.float32) * inv_len          # (1, 128)
    out_ref[...] = (
        jnp.dot(mean_h, w_gf[...], preferred_element_type=jnp.float32) + b_f1[...])  # (1, 128)


def _states_fusion_kernel(states_ref, geom_bias_ref,
                          sw1, sb1, w_sf, fw2, fb2, fw3, fb3, out_ref):
    """Row-tiled states + fusion path; geom contribution arrives as a resident bias row."""
    s = _k2_linear(states_ref[...], sw1, sb1)                                        # (T, 64)
    s = 0.5 * s * (1.0 + jax.lax.erf(s * _SQRT_HALF))                                # exact GELU
    f = jnp.dot(s, w_sf[...], preferred_element_type=jnp.float32) + geom_bias_ref[...]
    f = jnp.maximum(f, 0.0)                                                          # (T, 128)
    f = jnp.maximum(
        jnp.dot(f, fw2[...], preferred_element_type=jnp.float32) + fb2[...], 0.0)    # (T, 128)
    out_ref[...] = (
        jnp.dot(f, fw3[...], preferred_element_type=jnp.float32) + fb3[...]
    ).astype(out_ref.dtype)                                                          # (T, 4)


def _round_up(x, m):
    return (x + m - 1) // m * m


@jax.jit
def mlp_concat(coordinates, length, states, *params):
    (gw1, gb1, gw2, gb2, gw3, gb3,
     sw1, sb1, sw2, sb2,
     fw1, fb1, fw2, fb2, fw3, fb3) = params

    # One-time weight folds (pure parameter algebra).
    fw1_top = fw1[:D_MODEL, :]                     # geom half of fusion layer 1
    fw1_bot = fw1[D_MODEL:, :]                     # state half
    w_gf = gw3 @ fw1_top                           # (128, 128)
    w_sf = sw2 @ fw1_bot                           # (64, 128)
    b_f1 = gb3 @ fw1_top + sb2 @ fw1_bot + fb1     # (1, 128)

    nc = coordinates.shape[0]
    ns = states.shape[0]

    # ---- call 1 (grid=(1,)): geom branch -> (1,128) geom_bias, computed exactly once ----
    geom_weights = (gw1, gb1, gw2, gb2, w_gf, b_f1)
    geom_bias = pl.pallas_call(
        _geom_bias_kernel,
        out_shape=jax.ShapeDtypeStruct((1, D_MODEL), jnp.float32),
        grid_spec=pltpu.PrefetchScalarGridSpec(
            num_scalar_prefetch=1,
            grid=(1,),
            in_specs=[pl.BlockSpec((nc, D_COORD), lambda i, L: (0, 0))]
                     + [pl.BlockSpec(w.shape, lambda i, L: (0, 0)) for w in geom_weights],
            out_specs=pl.BlockSpec((1, D_MODEL), lambda i, L: (0, 0)),
        ),
        compiler_params=pltpu.CompilerParams(
            dimension_semantics=("arbitrary",),
            vmem_limit_bytes=VMEM_LIMIT,
        ),
    )(length, coordinates, *geom_weights)

    # ---- call 2: row-parallel states/fusion path ----
    # Even tile split (minimizes padding); force >= 2 steps above SPLIT_ROWS so the
    # "parallel" axis actually feeds both v7x TensorCores.
    num_tiles = pl.cdiv(ns, MAX_TILE)
    if ns > SPLIT_ROWS:
        num_tiles = max(num_tiles, 2)
    tile = _round_up(pl.cdiv(ns, num_tiles), 8)
    ns_pad = tile * num_tiles
    states_p = states if ns_pad == ns else jnp.pad(states, ((0, ns_pad - ns), (0, 0)))

    fuse_weights = (sw1, sb1, w_sf, fw2, fb2, fw3, fb3)
    in_specs = (
        [pl.BlockSpec((tile, D_STATE), lambda i: (i, 0)),        # states (row-tiled)
         pl.BlockSpec((1, D_MODEL), lambda i: (0, 0))]           # geom_bias (resident)
        + [pl.BlockSpec(w.shape, lambda i: (0, 0)) for w in fuse_weights]  # weights (resident)
    )

    out = pl.pallas_call(
        _states_fusion_kernel,
        out_shape=jax.ShapeDtypeStruct((ns_pad, D_TGT), jnp.float32),
        grid_spec=pltpu.PrefetchScalarGridSpec(
            num_scalar_prefetch=0,
            grid=(num_tiles,),
            in_specs=in_specs,
            out_specs=pl.BlockSpec((tile, D_TGT), lambda i: (i, 0)),
        ),
        compiler_params=pltpu.CompilerParams(
            dimension_semantics=("parallel",),       # shards rows across v7x's 2 TCs
            vmem_limit_bytes=VMEM_LIMIT,
        ),
    )(states_p, geom_bias, *fuse_weights)
    return out[:ns]


def make_params(key):
    """Deterministic parameter init. Weights stored as (in, out) — i.e. the transpose of
    torch's nn.Linear weight — so the math is x @ W + b."""
    dims = [
        # geom_mlp
        (D_COORD, D_MODEL // 2), (D_MODEL // 2, D_MODEL), (D_MODEL, D_MODEL),
        # states_mlp
        (D_STATE, D_MODEL // 2), (D_MODEL // 2, D_MODEL),
        # fusion_mlp
        (2 * D_MODEL, D_MODEL), (D_MODEL, D_MODEL), (D_MODEL, D_TGT),
    ]
    params = []
    keys = jax.random.split(key, 2 * len(dims))
    for i, (din, dout) in enumerate(dims):
        w = jax.random.normal(keys[2 * i], (din, dout), jnp.float32) * 0.05
        b = jax.random.normal(keys[2 * i + 1], (1, dout), jnp.float32) * 0.01
        params += [w, b]
    return params


def reference(coordinates, length, states, *params):
    (gw1, gb1, gw2, gb2, gw3, gb3,
     sw1, sb1, sw2, sb2,
     fw1, fb1, fw2, fb2, fw3, fb3) = params
    h = jnp.maximum(coordinates @ gw1 + gb1, 0.0)
    h = jnp.maximum(h @ gw2 + gb2, 0.0)
    geom = h @ gw3 + gb3
    geom = jnp.mean(geom[: int(length[0])], axis=0, keepdims=True)
    s = states @ sw1 + sb1
    s = 0.5 * s * (1.0 + jax.lax.erf(s / jnp.sqrt(2.0)))
    state = s @ sw2 + sb2
    fusion = jnp.concatenate(
        [jnp.broadcast_to(geom, (state.shape[0], geom.shape[1])), state], -1)
    f = jnp.maximum(fusion @ fw1 + fb1, 0.0)
    f = jnp.maximum(f @ fw2 + fb2, 0.0)
    return f @ fw3 + fb3


if __name__ == "__main__":
    key = jax.random.PRNGKey(0)
    k_coords, k_states, k_params = jax.random.split(key, 3)
    params = make_params(k_params)

    # Small case (Nc = Ns = 8 -> single tile, grid = 1).
    coordinates = jax.random.normal(k_coords, (8, D_COORD), jnp.float32)
    states = jax.random.normal(k_states, (8, D_STATE), jnp.float32)
    length = jnp.array([5], dtype=jnp.int32)

    out = jax.block_until_ready(mlp_concat(coordinates, length, states, *params))
    ref = reference(coordinates, length, states, *params)
    assert out.shape == (8, D_TGT), out.shape
    assert jnp.allclose(out, ref, atol=1e-4, rtol=1e-4), float(jnp.max(jnp.abs(out - ref)))

    # Larger, non-tile-multiple case (exercises the 2-step parallel grid, padding + slice).
    coords2 = jax.random.normal(jax.random.PRNGKey(1), (24, D_COORD), jnp.float32)
    states2 = jax.random.normal(jax.random.PRNGKey(2), (600, D_STATE), jnp.float32)
    length2 = jnp.array([17], dtype=jnp.int32)
    out2 = jax.block_until_ready(mlp_concat(coords2, length2, states2, *params))
    ref2 = reference(coords2, length2, states2, *params)
    assert out2.shape == (600, D_TGT), out2.shape
    assert jnp.allclose(out2, ref2, atol=1e-4, rtol=1e-4), float(jnp.max(jnp.abs(out2 - ref2)))

    print("KERNEL_OK")
</pallas_src>

<mosaic_0001>
module attributes {stable_mosaic.version = 11 : i64} {
  func.func @_geom_bias_kernel(%arg0: i32, %arg1: memref<1xi32, #tpu.memory_space<smem>>, %arg2: memref<8x2xf32, #tpu.memory_space<vmem>>, %arg3: memref<2x64xf32, #tpu.memory_space<vmem>>, %arg4: memref<1x64xf32, #tpu.memory_space<vmem>>, %arg5: memref<64x128xf32, #tpu.memory_space<vmem>>, %arg6: memref<1x128xf32, #tpu.memory_space<vmem>>, %arg7: memref<128x128xf32, #tpu.memory_space<vmem>>, %arg8: memref<1x128xf32, #tpu.memory_space<vmem>>, %arg9: memref<1x128xf32, #tpu.memory_space<vmem>>) attributes {dimension_semantics = [#tpu.dimension_semantics<arbitrary>], iteration_bounds = array<i64: 1>, scalar_prefetch = 1 : i64, scratch_operands = 0 : i64, tpu.core_type = #tpu.core_type<tc>, window_params = [{pipeline_mode = #tpu.pipeline_mode<synchronous>, transform_indices = @transform_0, window_bounds = array<i64: 8, 2>}, {pipeline_mode = #tpu.pipeline_mode<synchronous>, transform_indices = @transform_1, window_bounds = array<i64: 2, 64>}, {pipeline_mode = #tpu.pipeline_mode<synchronous>, transform_indices = @transform_2, window_bounds = array<i64: 1, 64>}, {pipeline_mode = #tpu.pipeline_mode<synchronous>, transform_indices = @transform_3, window_bounds = array<i64: 64, 128>}, {pipeline_mode = #tpu.pipeline_mode<synchronous>, transform_indices = @transform_4, window_bounds = array<i64: 1, 128>}, {pipeline_mode = #tpu.pipeline_mode<synchronous>, transform_indices = @transform_5, window_bounds = array<i64: 128, 128>}, {pipeline_mode = #tpu.pipeline_mode<synchronous>, transform_indices = @transform_6, window_bounds = array<i64: 1, 128>}, {pipeline_mode = #tpu.pipeline_mode<synchronous>, transform_indices = @transform_7, window_bounds = array<i64: 1, 128>}]} {
    %c0 = arith.constant 0 : index
    %c0_0 = arith.constant 0 : index
    %0 = vector.load %arg2[%c0, %c0_0] : memref<8x2xf32, #tpu.memory_space<vmem>>, vector<8x2xf32>
    %c0_1 = arith.constant 0 : index
    %c0_2 = arith.constant 0 : index
    %1 = vector.load %arg3[%c0_1, %c0_2] : memref<2x64xf32, #tpu.memory_space<vmem>>, vector<2x64xf32>
    %2 = vector.extract_strided_slice %0 {offsets = [0, 0], sizes = [8, 1], strides = [1, 1]} : vector<8x2xf32> to vector<8x1xf32>
    %3 = vector.extract_strided_slice %1 {offsets = [0, 0], sizes = [1, 64], strides = [1, 1]} : vector<2x64xf32> to vector<1x64xf32>
    %4 = vector.broadcast %2 : vector<8x1xf32> to vector<8x64xf32>
    %5 = vector.broadcast %3 : vector<1x64xf32> to vector<8x64xf32>
    %6 = arith.mulf %4, %5 : vector<8x64xf32>
    %7 = vector.extract_strided_slice %0 {offsets = [0, 1], sizes = [8, 1], strides = [1, 1]} : vector<8x2xf32> to vector<8x1xf32>
    %8 = vector.extract_strided_slice %1 {offsets = [1, 0], sizes = [1, 64], strides = [1, 1]} : vector<2x64xf32> to vector<1x64xf32>
    %9 = vector.broadcast %7 : vector<8x1xf32> to vector<8x64xf32>
    %10 = vector.broadcast %8 : vector<1x64xf32> to vector<8x64xf32>
    %11 = arith.mulf %9, %10 : vector<8x64xf32>
    %12 = arith.addf %6, %11 : vector<8x64xf32>
    %c0_3 = arith.constant 0 : index
    %c0_4 = arith.constant 0 : index
    %13 = vector.load %arg4[%c0_3, %c0_4] : memref<1x64xf32, #tpu.memory_space<vmem>>, vector<1x64xf32>
    %14 = vector.broadcast %13 : vector<1x64xf32> to vector<8x64xf32>
    %15 = arith.addf %12, %14 : vector<8x64xf32>
    %cst = arith.constant 0.000000e+00 : f32
    %16 = vector.broadcast %cst : f32 to vector<8x64xf32>
    %17 = arith.maximumf %15, %16 : vector<8x64xf32>
    %c0_5 = arith.constant 0 : index
    %c0_6 = arith.constant 0 : index
    %18 = vector.load %arg5[%c0_5, %c0_6] : memref<64x128xf32, #tpu.memory_space<vmem>>, vector<64x128xf32>
    %cst_7 = arith.constant dense<0.000000e+00> : vector<8x128xf32>
    %19 = tpu.matmul %17, %18, %cst_7 {dimension_numbers = #tpu.dot_dimension_numbers<[1], [0], [0], [1], [0, 0, 1, 1], [], []>} : vector<8x64xf32>, vector<64x128xf32>, vector<8x128xf32> -> vector<8x128xf32>
    %c0_8 = arith.constant 0 : index
    %c0_9 = arith.constant 0 : index
    %20 = vector.load %arg6[%c0_8, %c0_9] : memref<1x128xf32, #tpu.memory_space<vmem>>, vector<1x128xf32>
    %21 = vector.broadcast %20 : vector<1x128xf32> to vector<8x128xf32>
    %22 = arith.addf %19, %21 : vector<8x128xf32>
    %cst_10 = arith.constant 0.000000e+00 : f32
    %23 = vector.broadcast %cst_10 : f32 to vector<8x128xf32>
    %24 = arith.maximumf %22, %23 : vector<8x128xf32>
    %c0_11 = arith.constant 0 : index
    %25 = memref.load %arg1[%c0_11] : memref<1xi32, #tpu.memory_space<smem>>
    %c8_i32 = arith.constant 8 : i32
    %26 = arith.minsi %25, %c8_i32 : i32
    %c1_i32 = arith.constant 1 : i32
    %27 = arith.maxsi %26, %c1_i32 : i32
    %28 = arith.sitofp %27 : i32 to f32
    %cst_12 = arith.constant 1.000000e+00 : f32
    %29 = arith.divf %cst_12, %28 : f32
    %30 = tpu.iota {dimensions = array<i32: 1>} : vector<1x8xi32>
    %31 = vector.broadcast %26 : i32 to vector<1x8xi32>
    %32 = arith.cmpi slt, %30, %31 : vector<1x8xi32>
    %33 = arith.extui %32 : vector<1x8xi1> to vector<1x8xi32>
    %34 = arith.sitofp %33 : vector<1x8xi32> to vector<1x8xf32>
    %cst_13 = arith.constant dense<0.000000e+00> : vector<1x128xf32>
    %35 = tpu.matmul %34, %24, %cst_13 {dimension_numbers = #tpu.dot_dimension_numbers<[1], [0], [0], [1], [0, 0, 1, 1], [], []>} : vector<1x8xf32>, vector<8x128xf32>, vector<1x128xf32> -> vector<1x128xf32>
    %36 = vector.broadcast %29 : f32 to vector<1x128xf32>
    %37 = arith.mulf %35, %36 : vector<1x128xf32>
    %c0_14 = arith.constant 0 : index
    %c0_15 = arith.constant 0 : index
    %38 = vector.load %arg7[%c0_14, %c0_15] : memref<128x128xf32, #tpu.memory_space<vmem>>, vector<128x128xf32>
    %cst_16 = arith.constant dense<0.000000e+00> : vector<1x128xf32>
    %39 = tpu.matmul %37, %38, %cst_16 {dimension_numbers = #tpu.dot_dimension_numbers<[1], [0], [0], [1], [0, 0, 1, 1], [], []>} : vector<1x128xf32>, vector<128x128xf32>, vector<1x128xf32> -> vector<1x128xf32>
    %c0_17 = arith.constant 0 : index
    %c0_18 = arith.constant 0 : index
    %40 = vector.load %arg8[%c0_17, %c0_18] : memref<1x128xf32, #tpu.memory_space<vmem>>, vector<1x128xf32>
    %41 = arith.addf %39, %40 : vector<1x128xf32>
    %c0_19 = arith.constant 0 : index
    %c0_20 = arith.constant 0 : index
    %42 = vector.load %arg9[%c0_19, %c0_20] : memref<1x128xf32, #tpu.memory_space<vmem>>, vector<1x128xf32>
    tpu.vector_store %arg9[%c0_19, %c0_20], %41 {strides = array<i32>} : memref<1x128xf32, #tpu.memory_space<vmem>>, vector<1x128xf32>,
    return
  }
  func.func @transform_0(%arg0: i32, %arg1: memref<1xi32, #tpu.memory_space<smem>>) -> (i32, i32) {
    %c0_i32 = arith.constant 0 : i32
    %c0_i32_0 = arith.constant 0 : i32
    %c0_i32_1 = arith.constant 0 : i32
    return %c0_i32, %c0_i32_0 : i32, i32
  }
  func.func @transform_1(%arg0: i32, %arg1: memref<1xi32, #tpu.memory_space<smem>>) -> (i32, i32) {
    %c0_i32 = arith.constant 0 : i32
    %c0_i32_0 = arith.constant 0 : i32
    %c0_i32_1 = arith.constant 0 : i32
    return %c0_i32, %c0_i32_0 : i32, i32
  }
  func.func @transform_2(%arg0: i32, %arg1: memref<1xi32, #tpu.memory_space<smem>>) -> (i32, i32) {
    %c0_i32 = arith.constant 0 : i32
    %c0_i32_0 = arith.constant 0 : i32
    %c0_i32_1 = arith.constant 0 : i32
    return %c0_i32, %c0_i32_0 : i32, i32
  }
  func.func @transform_3(%arg0: i32, %arg1: memref<1xi32, #tpu.memory_space<smem>>) -> (i32, i32) {
    %c0_i32 = arith.constant 0 : i32
    %c0_i32_0 = arith.constant 0 : i32
    %c0_i32_1 = arith.constant 0 : i32
    return %c0_i32, %c0_i32_0 : i32, i32
  }
  func.func @transform_4(%arg0: i32, %arg1: memref<1xi32, #tpu.memory_space<smem>>) -> (i32, i32) {
    %c0_i32 = arith.constant 0 : i32
    %c0_i32_0 = arith.constant 0 : i32
    %c0_i32_1 = arith.constant 0 : i32
    return %c0_i32, %c0_i32_0 : i32, i32
  }
  func.func @transform_5(%arg0: i32, %arg1: memref<1xi32, #tpu.memory_space<smem>>) -> (i32, i32) {
    %c0_i32 = arith.constant 0 : i32
    %c0_i32_0 = arith.constant 0 : i32
    %c0_i32_1 = arith.constant 0 : i32
    return %c0_i32, %c0_i32_0 : i32, i32
  }
  func.func @transform_6(%arg0: i32, %arg1: memref<1xi32, #tpu.memory_space<smem>>) -> (i32, i32) {
    %c0_i32 = arith.constant 0 : i32
    %c0_i32_0 = arith.constant 0 : i32
    %c0_i32_1 = arith.constant 0 : i32
    return %c0_i32, %c0_i32_0 : i32, i32
  }
  func.func @transform_7(%arg0: i32, %arg1: memref<1xi32, #tpu.memory_space<smem>>) -> (i32, i32) {
    %c0_i32 = arith.constant 0 : i32
    %c0_i32_0 = arith.constant 0 : i32
    %c0_i32_1 = arith.constant 0 : i32
    return %c0_i32, %c0_i32_0 : i32, i32
  }
}

module attributes {stable_mosaic.version = 11 : i64} {
  func.func @_states_fusion_kernel(%arg0: i32, %arg1: memref<8x2xf32, #tpu.memory_space<vmem>>, %arg2: memref<1x128xf32, #tpu.memory_space<vmem>>, %arg3: memref<2x64xf32, #tpu.memory_space<vmem>>, %arg4: memref<1x64xf32, #tpu.memory_space<vmem>>, %arg5: memref<64x128xf32, #tpu.memory_space<vmem>>, %arg6: memref<128x128xf32, #tpu.memory_space<vmem>>, %arg7: memref<1x128xf32, #tpu.memory_space<vmem>>, %arg8: memref<128x4xf32, #tpu.memory_space<vmem>>, %arg9: memref<1x4xf32, #tpu.memory_space<vmem>>, %arg10: memref<8x4xf32, #tpu.memory_space<vmem>>) attributes {dimension_semantics = [#tpu.dimension_semantics<parallel>], iteration_bounds = array<i64: 1>, scalar_prefetch = 0 : i64, scratch_operands = 0 : i64, tpu.core_type = #tpu.core_type<tc>, window_params = [{transform_indices = @transform_0, window_bounds = array<i64: 8, 2>}, {pipeline_mode = #tpu.pipeline_mode<synchronous>, transform_indices = @transform_1, window_bounds = array<i64: 1, 128>}, {pipeline_mode = #tpu.pipeline_mode<synchronous>, transform_indices = @transform_2, window_bounds = array<i64: 2, 64>}, {pipeline_mode = #tpu.pipeline_mode<synchronous>, transform_indices = @transform_3, window_bounds = array<i64: 1, 64>}, {pipeline_mode = #tpu.pipeline_mode<synchronous>, transform_indices = @transform_4, window_bounds = array<i64: 64, 128>}, {pipeline_mode = #tpu.pipeline_mode<synchronous>, transform_indices = @transform_5, window_bounds = array<i64: 128, 128>}, {pipeline_mode = #tpu.pipeline_mode<synchronous>, transform_indices = @transform_6, window_bounds = array<i64: 1, 128>}, {pipeline_mode = #tpu.pipeline_mode<synchronous>, transform_indices = @transform_7, window_bounds = array<i64: 128, 4>}, {pipeline_mode = #tpu.pipeline_mode<synchronous>, transform_indices = @transform_8, window_bounds = array<i64: 1, 4>}, {transform_indices = @transform_9, window_bounds = array<i64: 8, 4>}]} {
    %c0 = arith.constant 0 : index
    %c0_0 = arith.constant 0 : index
    %0 = vector.load %arg1[%c0, %c0_0] : memref<8x2xf32, #tpu.memory_space<vmem>>, vector<8x2xf32>
    %c0_1 = arith.constant 0 : index
    %c0_2 = arith.constant 0 : index
    %1 = vector.load %arg3[%c0_1, %c0_2] : memref<2x64xf32, #tpu.memory_space<vmem>>, vector<2x64xf32>
    %2 = vector.extract_strided_slice %0 {offsets = [0, 0], sizes = [8, 1], strides = [1, 1]} : vector<8x2xf32> to vector<8x1xf32>
    %3 = vector.extract_strided_slice %1 {offsets = [0, 0], sizes = [1, 64], strides = [1, 1]} : vector<2x64xf32> to vector<1x64xf32>
    %4 = vector.broadcast %2 : vector<8x1xf32> to vector<8x64xf32>
    %5 = vector.broadcast %3 : vector<1x64xf32> to vector<8x64xf32>
    %6 = arith.mulf %4, %5 : vector<8x64xf32>
    %7 = vector.extract_strided_slice %0 {offsets = [0, 1], sizes = [8, 1], strides = [1, 1]} : vector<8x2xf32> to vector<8x1xf32>
    %8 = vector.extract_strided_slice %1 {offsets = [1, 0], sizes = [1, 64], strides = [1, 1]} : vector<2x64xf32> to vector<1x64xf32>
    %9 = vector.broadcast %7 : vector<8x1xf32> to vector<8x64xf32>
    %10 = vector.broadcast %8 : vector<1x64xf32> to vector<8x64xf32>
    %11 = arith.mulf %9, %10 : vector<8x64xf32>
    %12 = arith.addf %6, %11 : vector<8x64xf32>
    %c0_3 = arith.constant 0 : index
    %c0_4 = arith.constant 0 : index
    %13 = vector.load %arg4[%c0_3, %c0_4] : memref<1x64xf32, #tpu.memory_space<vmem>>, vector<1x64xf32>
    %14 = vector.broadcast %13 : vector<1x64xf32> to vector<8x64xf32>
    %15 = arith.addf %12, %14 : vector<8x64xf32>
    %cst = arith.constant 5.000000e-01 : f32
    %16 = vector.broadcast %cst : f32 to vector<8x64xf32>
    %17 = arith.mulf %16, %15 : vector<8x64xf32>
    %cst_5 = arith.constant 0.707106769 : f32
    %18 = vector.broadcast %cst_5 : f32 to vector<8x64xf32>
    %19 = arith.mulf %15, %18 : vector<8x64xf32>
    %20 = math.erf %19 : vector<8x64xf32>
    %cst_6 = arith.constant 1.000000e+00 : f32
    %21 = vector.broadcast %cst_6 : f32 to vector<8x64xf32>
    %22 = arith.addf %21, %20 : vector<8x64xf32>
    %23 = arith.mulf %17, %22 : vector<8x64xf32>
    %c0_7 = arith.constant 0 : index
    %c0_8 = arith.constant 0 : index
    %24 = vector.load %arg5[%c0_7, %c0_8] : memref<64x128xf32, #tpu.memory_space<vmem>>, vector<64x128xf32>
    %cst_9 = arith.constant dense<0.000000e+00> : vector<8x128xf32>
    %25 = tpu.matmul %23, %24, %cst_9 {dimension_numbers = #tpu.dot_dimension_numbers<[1], [0], [0], [1], [0, 0, 1, 1], [], []>} : vector<8x64xf32>, vector<64x128xf32>, vector<8x128xf32> -> vector<8x128xf32>
    %c0_10 = arith.constant 0 : index
    %c0_11 = arith.constant 0 : index
    %26 = vector.load %arg2[%c0_10, %c0_11] : memref<1x128xf32, #tpu.memory_space<vmem>>, vector<1x128xf32>
    %27 = vector.broadcast %26 : vector<1x128xf32> to vector<8x128xf32>
    %28 = arith.addf %25, %27 : vector<8x128xf32>
    %cst_12 = arith.constant 0.000000e+00 : f32
    %29 = vector.broadcast %cst_12 : f32 to vector<8x128xf32>
    %30 = arith.maximumf %28, %29 : vector<8x128xf32>
    %c0_13 = arith.constant 0 : index
    %c0_14 = arith.constant 0 : index
    %31 = vector.load %arg6[%c0_13, %c0_14] : memref<128x128xf32, #tpu.memory_space<vmem>>, vector<128x128xf32>
    %cst_15 = arith.constant dense<0.000000e+00> : vector<8x128xf32>
    %32 = tpu.matmul %30, %31, %cst_15 {dimension_numbers = #tpu.dot_dimension_numbers<[1], [0], [0], [1], [0, 0, 1, 1], [], []>} : vector<8x128xf32>, vector<128x128xf32>, vector<8x128xf32> -> vector<8x128xf32>
    %c0_16 = arith.constant 0 : index
    %c0_17 = arith.constant 0 : index
    %33 = vector.load %arg7[%c0_16, %c0_17] : memref<1x128xf32, #tpu.memory_space<vmem>>, vector<1x128xf32>
    %34 = vector.broadcast %33 : vector<1x128xf32> to vector<8x128xf32>
    %35 = arith.addf %32, %34 : vector<8x128xf32>
    %cst_18 = arith.constant 0.000000e+00 : f32
    %36 = vector.broadcast %cst_18 : f32 to vector<8x128xf32>
    %37 = arith.maximumf %35, %36 : vector<8x128xf32>
    %c0_19 = arith.constant 0 : index
    %c0_20 = arith.constant 0 : index
    %38 = vector.load %arg8[%c0_19, %c0_20] : memref<128x4xf32, #tpu.memory_space<vmem>>, vector<128x4xf32>
    %cst_21 = arith.constant dense<0.000000e+00> : vector<8x4xf32>
    %39 = tpu.matmul %37, %38, %cst_21 {dimension_numbers = #tpu.dot_dimension_numbers<[1], [0], [0], [1], [0, 0, 1, 1], [], []>} : vector<8x128xf32>, vector<128x4xf32>, vector<8x4xf32> -> vector<8x4xf32>
    %c0_22 = arith.constant 0 : index
    %c0_23 = arith.constant 0 : index
    %40 = vector.load %arg9[%c0_22, %c0_23] : memref<1x4xf32, #tpu.memory_space<vmem>>, vector<1x4xf32>
    %41 = vector.broadcast %40 : vector<1x4xf32> to vector<8x4xf32>
    %42 = arith.addf %39, %41 : vector<8x4xf32>
    %c0_24 = arith.constant 0 : index
    %c0_25 = arith.constant 0 : index
    %43 = vector.load %arg10[%c0_24, %c0_25] : memref<8x4xf32, #tpu.memory_space<vmem>>, vector<8x4xf32>
    tpu.vector_store %arg10[%c0_24, %c0_25], %42 {strides = array<i32>} : memref<8x4xf32, #tpu.memory_space<vmem>>, vector<8x4xf32>,
    return
  }
  func.func @transform_0(%arg0: i32) -> (i32, i32) {
    %c0_i32 = arith.constant 0 : i32
    %c0_i32_0 = arith.constant 0 : i32
    return %arg0, %c0_i32 : i32, i32
  }
  func.func @transform_1(%arg0: i32) -> (i32, i32) {
    %c0_i32 = arith.constant 0 : i32
    %c0_i32_0 = arith.constant 0 : i32
    %c0_i32_1 = arith.constant 0 : i32
    return %c0_i32, %c0_i32_0 : i32, i32
  }
  func.func @transform_2(%arg0: i32) -> (i32, i32) {
    %c0_i32 = arith.constant 0 : i32
    %c0_i32_0 = arith.constant 0 : i32
    %c0_i32_1 = arith.constant 0 : i32
    return %c0_i32, %c0_i32_0 : i32, i32
  }
  func.func @transform_3(%arg0: i32) -> (i32, i32) {
    %c0_i32 = arith.constant 0 : i32
    %c0_i32_0 = arith.constant 0 : i32
    %c0_i32_1 = arith.constant 0 : i32
    return %c0_i32, %c0_i32_0 : i32, i32
  }
  func.func @transform_4(%arg0: i32) -> (i32, i32) {
    %c0_i32 = arith.constant 0 : i32
    %c0_i32_0 = arith.constant 0 : i32
    %c0_i32_1 = arith.constant 0 : i32
    return %c0_i32, %c0_i32_0 : i32, i32
  }
  func.func @transform_5(%arg0: i32) -> (i32, i32) {
    %c0_i32 = arith.constant 0 : i32
    %c0_i32_0 = arith.constant 0 : i32
    %c0_i32_1 = arith.constant 0 : i32
    return %c0_i32, %c0_i32_0 : i32, i32
  }
  func.func @transform_6(%arg0: i32) -> (i32, i32) {
    %c0_i32 = arith.constant 0 : i32
    %c0_i32_0 = arith.constant 0 : i32
    %c0_i32_1 = arith.constant 0 : i32
    return %c0_i32, %c0_i32_0 : i32, i32
  }
  func.func @transform_7(%arg0: i32) -> (i32, i32) {
    %c0_i32 = arith.constant 0 : i32
    %c0_i32_0 = arith.constant 0 : i32
    %c0_i32_1 = arith.constant 0 : i32
    return %c0_i32, %c0_i32_0 : i32, i32
  }
  func.func @transform_8(%arg0: i32) -> (i32, i32) {
    %c0_i32 = arith.constant 0 : i32
    %c0_i32_0 = arith.constant 0 : i32
    %c0_i32_1 = arith.constant 0 : i32
    return %c0_i32, %c0_i32_0 : i32, i32
  }
  func.func @transform_9(%arg0: i32) -> (i32, i32) {
    %c0_i32 = arith.constant 0 : i32
    %c0_i32_0 = arith.constant 0 : i32
    return %arg0, %c0_i32 : i32, i32
  }
}

</mosaic_0001>

<bundles_post_ra>
// kernel: mlp_concat.2
= control target key start
LH: loop header
LB: loop body
LE: loop exit
PB: predicated region body
PF: predicated region fallthrough
CT: control target
= control target key end

     0   :  { %v478_v0 = vmov 0   ;;  %v479_v2 = vmov 0.0|0.0   ;;  %v480_v11 = vmov 1   ;;  %vm481_vm0 = vmmov 0   ;;  %s653_s1 = inlined_call_operand.vmem [shape: f32[8,2], index: 1, kind: input, shape index: {}]   ;;  %s654_s4 = inlined_call_operand.vmem [shape: f32[64,128], index: 4, kind: input, shape index: {}]   ;;  %s655_s2 = inlined_call_operand.vmem [shape: f32[2,64], index: 2, kind: input, shape index: {}]   ;;  %s656_s3 = inlined_call_operand.vmem [shape: f32[1,64], index: 3, kind: input, shape index: {}]   ;;  %s657_s0 = inlined_call_operand.<no memory space> [shape: s32[1], index: 0, kind: input, shape index: {}]   ;;  %s658_s6 = inlined_call_operand.vmem [shape: f32[128,128], index: 6, kind: input, shape index: {}]   ;;  %s659_s5 = inlined_call_operand.vmem [shape: f32[1,128], index: 5, kind: input, shape index: {}]   ;;  %s660_s7 = inlined_call_operand.vmem [shape: f32[1,128], index: 7, kind: input, shape index: {}]   ;;  %s661_s8 = inlined_call_operand.vmem [shape: f32[1,128], index: 8, kind: output, shape index: {}]  }
   0x1   :  { %474 = vset.pattern.permute.xlu0 %v478_v0  ;;  %v28_v1 = vld [vmem:[%s653_s1] sm:$0xff]  ;;  %431 = vmatprep.subr.bf16.mxu0 %v479_v2  ;;  %v60_v4 = vld [vmem:[%s654_s4 + $0x8] sm:$0xff]  ;;  %v61_v6 = vld [vmem:[%s654_s4 + $0x10] sm:$0xff]  ;;  %v482_v16 = vmov 0.0   ;;  %v35_v17 = vlaneseq  ;;  %vm74_vm1 = vcmask 523264   ;;  %p150_p0 = scmp.lt.s32.totalorder %s657_s0, 8 }
   0x2   :  { %v59_v3 = vld [vmem:[%s654_s4] sm:$0xff]  ;;  %32 = vperm.xlu0 %474, %v28_v1   ;;  %v62_v7 = vld [vmem:[%s654_s4 + $0x18] sm:$0xff]  ;;  %443 = vmatprep.subr.bf16.mxu1 %v479_v2  ;;  %v64_v10 = vld [vmem:[%s654_s4 + $0x28] sm:$0xff]  ;;  %p335_p1 = scmp.gt.s32.totalorder %s657_s0, 1  ;;  %vm164_vm3 = vcmask 64512  }
   0x3   :  { %v432_v5 = vpack.c.bf16 %v60_v4, %v59_v3  ;;  %v435_v8 = vpack.c.bf16 %v62_v7, %v61_v6  ;;  %v63_v9 = vld [vmem:[%s654_s4 + $0x20] sm:$0xff]  ;;  %v65_v13 = vld [vmem:[%s654_s4 + $0x30] sm:$0xff]  ;;  %v66_v14 = vld [vmem:[%s654_s4 + $0x38] sm:$0xff]  ;;  %388 = vmatprep.mubr.msk.f32.mxu0 %vm481_vm0, %v482_v16  ;;  %428 = vmatprep.mubr.msk.f32.mxu1 %vm481_vm0, %v482_v16  ;;  %v36_v18 = vshrl.u32 %v35_v17, 7  ;;  %s580_s28 = scalar_select %p150_p0, %s657_s0, 8  ;;  %v159_v55 = vand.u32 127, %v35_v17 }
   0x4   :  { %v438_v12 = vpack.c.bf16 %v64_v10, %v63_v9  ;;  %v441_v15 = vpack.c.bf16 %v66_v14, %v65_v13  ;;  %v29_v21 = vld [vmem:[%s655_s2] sm:$0x3]  ;;  %v241_v33 = vld [vmem:[%s658_s6 + $0x8] sm:$0xff]  ;;  %v242_v34 = vld [vmem:[%s658_s6 + $0x10] sm:$0xff] }
   0x5   :  { %433 = vmatpush3.bf16.msra.mxu0 %v432_v5  ;;  %v37_v19 = vsub.s32 0, %v36_v18  ;;  %v46_v20 = vsub.s32 1, %v36_v18  ;;  %v332_v28 = vld [vmem:[%s656_s3] ss:$0 sm:$0xff]  ;;  %s343_s14 = scalar_select %p335_p1, %s580_s28, 1  ;;  %v243_v36 = vld [vmem:[%s658_s6 + $0x18] sm:$0xff]  ;;  %v160_v56 = vstv %s580_s28 }
   0x6   :  { %434 = vmatprep.subr.bf16.mxu0 %v479_v2  ;;  %475 = vset.pattern.permute.xlu0 %v480_v11  ;;  %v240_v32 = vld [vmem:[%s658_s6] sm:$0xff]  ;;  %v447_v37 = vpack.c.bf16 %v243_v36, %v242_v34  ;;  %v245_v39 = vld [vmem:[%s658_s6 + $0x28] sm:$0xff]  ;;  %v246_v42 = vld [vmem:[%s658_s6 + $0x30] sm:$0xff]  ;;  %vm161_vm2 = vcmp.lt.s32.totalorder %v159_v55, %v160_v56 }
   0x7   :  { %41 = vperm.xlu0 %475, %v28_v1   ;;  %v38_v23 = vrot.slane %v29_v21, %v37_v19  ;;  %v47_v24 = vrot.slane %v29_v21, %v46_v20  ;;  %v444_v35 = vpack.c.bf16 %v241_v33, %v240_v32  ;;  %s154_s16 = scvt.s32.f32 %s343_s14  ;;  %v244_v38 = vld [vmem:[%s658_s6 + $0x20] sm:$0xff]  ;;  %v247_v43 = vld [vmem:[%s658_s6 + $0x38] sm:$0xff]  ;;  %v249_v46 = vld [vmem:[%s658_s6 + $0x48] sm:$0xff]  ;;  %v340_v62 = vsel %vm161_vm2, 1.0, %v482_v16 }
   0x8   :  { %v450_v41 = vpack.c.bf16 %v245_v39, %v244_v38  ;;  %v453_v44 = vpack.c.bf16 %v247_v43, %v246_v42  ;;  %v248_v45 = vld [vmem:[%s658_s6 + $0x40] sm:$0xff]  ;;  %v250_v49 = vld [vmem:[%s658_s6 + $0x50] sm:$0xff]  ;;  %v251_v50 = vld [vmem:[%s658_s6 + $0x58] sm:$0xff] }
   0x9   :  { %436 = vmatpush3.bf16.msra.mxu0 %v435_v8  ;;  %445 = vmatpush3.bf16.msra.mxu1 %v444_v35  ;;  %v155_v40 = vstv %s154_s16  ;;  %v456_v47 = vpack.c.bf16 %v249_v46, %v248_v45  ;;  %v459_v51 = vpack.c.bf16 %v251_v50, %v250_v49  ;;  %v252_v52 = vld [vmem:[%s658_s6 + $0x60] sm:$0xff]  ;;  %v253_v53 = vld [vmem:[%s658_s6 + $0x68] sm:$0xff]  ;;  %v254_v63 = vld [vmem:[%s658_s6 + $0x70] sm:$0xff] }
   0xa   :  { %437 = vmatprep.subr.bf16.mxu0 %v479_v2  ;;  %446 = vmatprep.subr.bf16.mxu1 %v479_v2  ;;  %476 = vrcp.f32 %v155_v40  ;;  %v462_v54 = vpack.c.bf16 %v253_v53, %v252_v52  ;;  %v333_v57 = vld [vmem:[%s659_s5] ss:$0 sm:$0xff]  ;;  %v255_v0 = vld [vmem:[%s658_s6 + $0x78] sm:$0xff] }
   0xb   :  { %v465_v1 = vpack.c.bf16 %v255_v0, %v254_v63  ;;  %v256_v6 = vld [vmem:[%s660_s7] sm:$0x1] }
   0xd   :  { %439 = vmatpush3.bf16.msra.mxu0 %v438_v12  ;;  %448 = vmatpush3.bf16.msra.mxu1 %v447_v37 }
   0xe   :  { %440 = vmatprep.subr.bf16.mxu0 %v479_v2  ;;  %449 = vmatprep.subr.bf16.mxu1 %v479_v2 }
  0x11   :  { %442 = vmatpush3.bf16.msra.mxu0 %v441_v15  ;;  %451 = vmatpush3.bf16.msra.mxu1 %v450_v41 }
  0x12   :  { %391 = vmatprep.subr.mxu0 %v482_v16  ;;  %452 = vmatprep.subr.bf16.mxu1 %v479_v2 }
  0x14   :  { %v477_v48 = vpop.eup %476 }
  0x15   :  { %454 = vmatpush3.bf16.msra.mxu1 %v453_v44  ;;  %467 = vpush %v477_v48 }
  0x16   :  { %455 = vmatprep.subr.bf16.mxu1 %v479_v2 }
  0x19   :  { %457 = vmatpush3.bf16.msra.mxu1 %v456_v47 }
  0x1a   :  { %458 = vmatprep.subr.bf16.mxu1 %v479_v2 }
  0x1d   :  { %460 = vmatpush3.bf16.msra.mxu1 %v459_v51 }
  0x1e   :  { %461 = vmatprep.subr.bf16.mxu1 %v479_v2 }
  0x21   :  { %463 = vmatpush3.bf16.msra.mxu1 %v462_v54 }
  0x22   :  { %464 = vmatprep.subr.bf16.mxu1 %v479_v2 }
  0x25   :  { %466 = vmatpush3.bf16.msra.mxu1 %v465_v1 }
  0x46   :  { %s468_s5 = spop %467 }
  0x47   :  { %v238_v2 = vstv %s468_s5 }
  0x81   :  { %v33_v22 = vpop.permute.xlu0 %32 }
  0x82   :  { %v39_v26 = vmul.f32 %v38_v23, %v33_v22 }
  0x86   :  { %v42_v25 = vpop.permute.xlu0 %41 }
  0x87   :  { %v48_v27 = vmul.f32 %v47_v24, %v42_v25 }
  0x89   :  { %v49_v29 = vadd.f32 %v48_v27, %v39_v26 }
  0x8b   :  { %v57_v30 = vadd.f32 %v332_v28, %v49_v29 }
  0x8d   :  { %v58_v31 = vmax.f32 %v57_v30, 0.0 }
  0x8f   :  { %389 = vmatmul.mubr.msk.f32.vlgmr.msra.gmra.mrb[0].mxu0 %vm74_vm1, %v58_v31 }
  0x90   :  { %393 = vmatprep.mubr.msk.f32.mxu0 %vm481_vm0, %v482_v16 }
 0x162   :  { %v144_v58 = vpop.f32.mrb[0].mxu0 }
 0x163   :  { %v145_v59 = vadd.f32 %v333_v57, %v144_v58  ;;  %v390_v60 = vpop.f32.mrb[1].mxu0 }
 0x165   :  { %v148_v61 = vmax.f32 %v145_v59, 0.0 }
 0x167   :  { %392 = vmatpush3.msra.mxu0 %v148_v61 }
 0x168   :  { %394 = vmatmul.mubr.msk.f32.vlgmr.msra.gmra.mrb[2].mxu0 %vm164_vm3, %v340_v62 }
 0x23b   :  { %v234_v3 = vpop.f32.mrb[2].mxu0 }
 0x23c   :  { %v239_v4 = vmul.f32 %v238_v2, %v234_v3  ;;  %v395_v5 = vpop.f32.mrb[3].mxu0 }
 0x23e   :  { %429 = vmatmul.mubr.f32.vlgmr.msra.gmra.mrb[0].mxu1 %v239_v4 }
 0x311   :  { %v323_v7 = vpop.f32.mrb[0].mxu1 }
 0x312   :  { %v324_v8 = vadd.f32 %v323_v7, %v256_v6  ;;  %v430_v9 = vpop.f32.mrb[1].mxu1 }
 0x314   :  { %327 = vst [vmem:[%s661_s8] sm:$0x1] %v324_v8 }

// kernel: mlp_concat.3
= control target key start
LH: loop header
LB: loop body
LE: loop exit
PB: predicated region body
PF: predicated region fallthrough
CT: control target
= control target key end

     0   :  { %v556_v0 = vmov 0   ;;  %v557_v2 = vmov 1   ;;  %v558_v6 = vmov 0.0|0.0   ;;  %vm559_vm0 = vmmov 0   ;;  %s778_s0 = inlined_call_operand.vmem [shape: f32[8,2], index: 0, kind: input, shape index: {}]   ;;  %s779_s4 = inlined_call_operand.vmem [shape: f32[64,128], index: 4, kind: input, shape index: {}]   ;;  %s780_s5 = inlined_call_operand.vmem [shape: f32[128,128], index: 5, kind: input, shape index: {}]   ;;  %s781_s2 = inlined_call_operand.vmem [shape: f32[2,64], index: 2, kind: input, shape index: {}]   ;;  %s782_s3 = inlined_call_operand.vmem [shape: f32[1,64], index: 3, kind: input, shape index: {}]   ;;  %s783_s7 = inlined_call_operand.vmem [shape: f32[128,4], index: 7, kind: input, shape index: {}]   ;;  %s784_s1 = inlined_call_operand.vmem [shape: f32[1,128], index: 1, kind: input, shape index: {}]   ;;  %s785_s6 = inlined_call_operand.vmem [shape: f32[1,128], index: 6, kind: input, shape index: {}]   ;;  %s786_s8 = inlined_call_operand.vmem [shape: f32[1,4], index: 8, kind: input, shape index: {}]   ;;  %s787_s9 = inlined_call_operand.vmem [shape: f32[8,4], index: 9, kind: output, shape index: {}]  }
   0x1   :  { %552 = vset.pattern.permute.xlu0 %v556_v0  ;;  %v32_v1 = vld [vmem:[%s778_s0] sm:$0xff]  ;;  %v68_v4 = vld [vmem:[%s779_s4 + $0x8] sm:$0xff]  ;;  %487 = vmatprep.subr.bf16.mxu0 %v558_v6  ;;  %v69_v7 = vld [vmem:[%s779_s4 + $0x10] sm:$0xff]  ;;  %v560_v12 = vmov 0.0   ;;  %v39_v38 = vlaneseq  ;;  %vm82_vm1 = vcmask 523264   ;;  %vm344_vm2 = vcmask 31744  }
   0x2   :  { %36 = vperm.xlu0 %552, %v32_v1   ;;  %v67_v3 = vld [vmem:[%s779_s4] sm:$0xff]  ;;  %499 = vmatprep.subr.bf16.mxu1 %v558_v6  ;;  %v70_v8 = vld [vmem:[%s779_s4 + $0x18] sm:$0xff]  ;;  %v72_v11 = vld [vmem:[%s779_s4 + $0x28] sm:$0xff] }
   0x3   :  { %v488_v5 = vpack.c.bf16 %v68_v4, %v67_v3  ;;  %v491_v9 = vpack.c.bf16 %v70_v8, %v69_v7  ;;  %v71_v10 = vld [vmem:[%s779_s4 + $0x20] sm:$0xff]  ;;  %414 = vmatprep.mubr.msk.f32.mxu0 %vm559_vm0, %v560_v12  ;;  %449 = vmatprep.mubr.msk.f32.mxu1 %vm559_vm0, %v560_v12  ;;  %v73_v14 = vld [vmem:[%s779_s4 + $0x30] sm:$0xff]  ;;  %v74_v15 = vld [vmem:[%s779_s4 + $0x38] sm:$0xff]  ;;  %v40_v39 = vshrl.u32 %v39_v38, 7 }
   0x4   :  { %v494_v13 = vpack.c.bf16 %v72_v11, %v71_v10  ;;  %v497_v16 = vpack.c.bf16 %v74_v15, %v73_v14  ;;  %v157_v17 = vld [vmem:[%s780_s5] sm:$0xff]  ;;  %v158_v18 = vld [vmem:[%s780_s5 + $0x8] sm:$0xff]  ;;  %v159_v19 = vld [vmem:[%s780_s5 + $0x10] sm:$0xff] }
   0x5   :  { %489 = vmatpush3.bf16.msra.mxu0 %v488_v5  ;;  %v500_v20 = vpack.c.bf16 %v158_v18, %v157_v17  ;;  %v160_v21 = vld [vmem:[%s780_s5 + $0x18] sm:$0xff]  ;;  %v161_v23 = vld [vmem:[%s780_s5 + $0x20] sm:$0xff]  ;;  %v162_v24 = vld [vmem:[%s780_s5 + $0x28] sm:$0xff]  ;;  %v41_v40 = vsub.s32 0, %v40_v39  ;;  %v50_v41 = vsub.s32 1, %v40_v39 }
   0x6   :  { %553 = vset.pattern.permute.xlu0 %v557_v2  ;;  %490 = vmatprep.subr.bf16.mxu0 %v558_v6  ;;  %v503_v22 = vpack.c.bf16 %v160_v21, %v159_v19  ;;  %v506_v25 = vpack.c.bf16 %v162_v24, %v161_v23  ;;  %v163_v26 = vld [vmem:[%s780_s5 + $0x30] sm:$0xff]  ;;  %v164_v27 = vld [vmem:[%s780_s5 + $0x38] sm:$0xff]  ;;  %v165_v29 = vld [vmem:[%s780_s5 + $0x40] sm:$0xff] }
   0x7   :  { %45 = vperm.xlu0 %553, %v32_v1   ;;  %501 = vmatpush3.bf16.msra.mxu1 %v500_v20  ;;  %v509_v28 = vpack.c.bf16 %v164_v27, %v163_v26  ;;  %v166_v30 = vld [vmem:[%s780_s5 + $0x48] sm:$0xff]  ;;  %v167_v32 = vld [vmem:[%s780_s5 + $0x50] sm:$0xff]  ;;  %v168_v33 = vld [vmem:[%s780_s5 + $0x58] sm:$0xff] }
   0x8   :  { %502 = vmatprep.subr.bf16.mxu1 %v558_v6  ;;  %v512_v31 = vpack.c.bf16 %v166_v30, %v165_v29  ;;  %v515_v34 = vpack.c.bf16 %v168_v33, %v167_v32  ;;  %v169_v35 = vld [vmem:[%s780_s5 + $0x60] sm:$0xff]  ;;  %v170_v36 = vld [vmem:[%s780_s5 + $0x68] sm:$0xff]  ;;  %v171_v57 = vld [vmem:[%s780_s5 + $0x70] sm:$0xff] }
   0x9   :  { %492 = vmatpush3.bf16.msra.mxu0 %v491_v9  ;;  %v518_v37 = vpack.c.bf16 %v170_v36, %v169_v35  ;;  %v33_v42 = vld [vmem:[%s781_s2] sm:$0x3]  ;;  %v172_v58 = vld [vmem:[%s780_s5 + $0x78] sm:$0xff]  ;;  %v252_v61 = vld [vmem:[%s783_s7 + $0x8] sm:$0xff] }
   0xa   :  { %493 = vmatprep.subr.bf16.mxu0 %v558_v6  ;;  %v42_v44 = vrot.slane %v33_v42, %v41_v40  ;;  %v51_v45 = vrot.slane %v33_v42, %v50_v41  ;;  %v350_v49 = vld [vmem:[%s782_s3] ss:$0 sm:$0xff]  ;;  %v521_v59 = vpack.c.bf16 %v172_v58, %v171_v57  ;;  %v253_v62 = vld [vmem:[%s783_s7 + $0x10] sm:$0xff]  ;;  %v254_v0 = vld [vmem:[%s783_s7 + $0x18] sm:$0xff] }
   0xb   :  { %504 = vmatpush3.bf16.msra.mxu1 %v503_v22  ;;  %v251_v60 = vld [vmem:[%s783_s7] sm:$0xff]  ;;  %v527_v1 = vpack.c.bf16 %v254_v0, %v253_v62  ;;  %v256_v3 = vld [vmem:[%s783_s7 + $0x28] sm:$0xff]  ;;  %v257_v5 = vld [vmem:[%s783_s7 + $0x30] sm:$0xff] }
   0xc   :  { %505 = vmatprep.subr.bf16.mxu1 %v558_v6  ;;  %v524_v63 = vpack.c.bf16 %v252_v61, %v251_v60  ;;  %v255_v2 = vld [vmem:[%s783_s7 + $0x20] sm:$0xff]  ;;  %v258_v7 = vld [vmem:[%s783_s7 + $0x38] sm:$0xff]  ;;  %v260_v10 = vld [vmem:[%s783_s7 + $0x48] sm:$0xff] }
   0xd   :  { %495 = vmatpush3.bf16.msra.mxu0 %v494_v13  ;;  %v530_v4 = vpack.c.bf16 %v256_v3, %v255_v2  ;;  %v533_v8 = vpack.c.bf16 %v258_v7, %v257_v5  ;;  %v259_v9 = vld [vmem:[%s783_s7 + $0x40] sm:$0xff]  ;;  %v262_v13 = vld [vmem:[%s783_s7 + $0x58] sm:$0xff]  ;;  %v265_v23 = vld [vmem:[%s783_s7 + $0x70] sm:$0xff] }
   0xe   :  { %496 = vmatprep.subr.bf16.mxu0 %v558_v6  ;;  %v536_v11 = vpack.c.bf16 %v260_v10, %v259_v9  ;;  %v263_v15 = vld [vmem:[%s783_s7 + $0x60] sm:$0xff]  ;;  %v266_v24 = vld [vmem:[%s783_s7 + $0x78] sm:$0xff] }
   0xf   :  { %507 = vmatpush3.bf16.msra.mxu1 %v506_v25  ;;  %v351_v18 = vld [vmem:[%s784_s1] ss:$0 sm:$0xff]  ;;  %v545_v25 = vpack.c.bf16 %v266_v24, %v265_v23 }
  0x10   :  { %508 = vmatprep.subr.bf16.mxu1 %v558_v6  ;;  %v354_v30 = vld [vmem:[%s786_s8] ss:$0 sm:$0xff] }
  0x11   :  { %498 = vmatpush3.bf16.msra.mxu0 %v497_v16  ;;  %v264_v16 = vld [vmem:[%s783_s7 + $0x68] sm:$0xff] }
  0x12   :  { %523 = vmatprep.subr.bf16.mxu0 %v558_v6  ;;  %v542_v17 = vpack.c.bf16 %v264_v16, %v263_v15 }
  0x13   :  { %510 = vmatpush3.bf16.msra.mxu1 %v509_v28 }
  0x14   :  { %511 = vmatprep.subr.bf16.mxu1 %v558_v6 }
  0x17   :  { %513 = vmatpush3.bf16.msra.mxu1 %v512_v31 }
  0x18   :  { %514 = vmatprep.subr.bf16.mxu1 %v558_v6 }
  0x1b   :  { %516 = vmatpush3.bf16.msra.mxu1 %v515_v34 }
  0x1c   :  { %517 = vmatprep.subr.bf16.mxu1 %v558_v6 }
  0x1f   :  { %519 = vmatpush3.bf16.msra.mxu1 %v518_v37 }
  0x20   :  { %520 = vmatprep.subr.bf16.mxu1 %v558_v6 }
  0x23   :  { %522 = vmatpush3.bf16.msra.mxu1 %v521_v59 }
  0x81   :  { %v37_v43 = vpop.permute.xlu0 %36 }
  0x82   :  { %v43_v47 = vmul.f32 %v42_v44, %v37_v43 }
  0x86   :  { %v46_v46 = vpop.permute.xlu0 %45 }
  0x87   :  { %v52_v48 = vmul.f32 %v51_v45, %v46_v46 }
  0x89   :  { %v53_v50 = vadd.f32 %v52_v48, %v43_v47 }
  0x8b   :  { %v61_v51 = vadd.f32 %v350_v49, %v53_v50 }
  0x8d   :  { %v63_v52 = vmul.f32 0.70710677, %v61_v51  ;;  %v62_v54 = vmul.f32 0.5, %v61_v51 }
  0x8f   :  { %554 = verf.f32 %v63_v52 }
  0x99   :  { %v555_v53 = vpop.eup %554 }
  0x9a   :  { %v65_v55 = vadd.f32 1.0, %v555_v53 }
  0x9c   :  { %v66_v56 = vmul.f32 %v65_v55, %v62_v54 }
  0x9e   :  { %415 = vmatmul.mubr.msk.f32.vlgmr.msra.gmra.mrb[0].mxu0 %vm82_vm1, %v66_v56 }
  0x9f   :  { %484 = vmatprep.mubr.msk.f32.mxu0 %vm559_vm0, %v560_v12  ;;  %525 = vmatpush3.bf16.msra.mxu0 %v524_v63  ;;  %v261_v12 = vld [vmem:[%s783_s7 + $0x50] sm:$0xff] }
  0xa0   :  { %526 = vmatprep.subr.bf16.mxu0 %v558_v6  ;;  %v539_v14 = vpack.c.bf16 %v262_v13, %v261_v12 }
  0xa3   :  { %528 = vmatpush3.bf16.msra.mxu0 %v527_v1 }
  0xa4   :  { %529 = vmatprep.subr.bf16.mxu0 %v558_v6 }
  0xa7   :  { %531 = vmatpush3.bf16.msra.mxu0 %v530_v4 }
  0xa8   :  { %532 = vmatprep.subr.bf16.mxu0 %v558_v6 }
  0xab   :  { %534 = vmatpush3.bf16.msra.mxu0 %v533_v8 }
  0xac   :  { %535 = vmatprep.subr.bf16.mxu0 %v558_v6 }
  0xaf   :  { %537 = vmatpush3.bf16.msra.mxu0 %v536_v11 }
  0xb0   :  { %538 = vmatprep.subr.bf16.mxu0 %v558_v6 }
  0xb3   :  { %540 = vmatpush3.bf16.msra.mxu0 %v539_v14 }
  0xb4   :  { %541 = vmatprep.subr.bf16.mxu0 %v558_v6 }
  0xb7   :  { %543 = vmatpush3.bf16.msra.mxu0 %v542_v17 }
  0xb8   :  { %544 = vmatprep.subr.bf16.mxu0 %v558_v6  ;;  %v353_v6 = vld [vmem:[%s785_s6] ss:$0 sm:$0xff] }
  0xbb   :  { %546 = vmatpush3.bf16.msra.mxu0 %v545_v25 }
 0x171   :  { %v152_v19 = vpop.f32.mrb[0].mxu0 }
 0x172   :  { %v153_v20 = vadd.f32 %v351_v18, %v152_v19  ;;  %v416_v21 = vpop.f32.mrb[1].mxu0 }
 0x174   :  { %v156_v22 = vmax.f32 %v153_v20, 0.0 }
 0x176   :  { %450 = vmatmul.mubr.f32.vlgmr.msra.gmra.mrb[0].mxu1 %v156_v22 }
 0x249   :  { %v246_v26 = vpop.f32.mrb[0].mxu1 }
 0x24a   :  { %v247_v27 = vadd.f32 %v353_v6, %v246_v26  ;;  %v451_v28 = vpop.f32.mrb[1].mxu1 }
 0x24c   :  { %v250_v29 = vmax.f32 %v247_v27, 0.0 }
 0x24e   :  { %485 = vmatmul.mubr.f32.vlgmr.msra.gmra.mrb[2].mxu0 %v250_v29 }
 0x321   :  { %v340_v31 = vpop.f32.mrb[2].mxu0 }
 0x322   :  { %v341_v32 = vadd.f32 %v354_v30, %v340_v31  ;;  %v486_v33 = vpop.f32.mrb[3].mxu0 }
 0x324   :  { %345 = vst.msk [vmem:[%s787_s9] sm:$0xff] %vm344_vm2, %v341_v32 }

</bundles_post_ra>
